<compile_context>
chip_gen: v6e
topology: v6e:2x2x1
jax: 0.10.0
libtpu: 0.0.40
codegen_flags: <defaults>
</compile_context>

<pallas_src>
import jax
import jax.numpy as jnp
from jax.experimental import pallas as pl
from jax.experimental.pallas import tpu as pltpu

_SUBLANE = 8


# ---------------------------------------------------------------------------
# PackedTensor stand-in (matches the attribute access in DDP.forward)
# ---------------------------------------------------------------------------
class PackedTensor:
    def __init__(self, tensor):
        self.tensor = tensor


def _round_up(x, m):
    return (x + m - 1) // m * m


def _choose_batch_tile(B, block_b):
    """Pick the batch tile.

    - tiny batches: one full-array tile (always layout-legal);
    - otherwise a multiple-of-8 tile capped at block_b, shrunk (if needed) so
      the grid has >= 2 steps — lets the "parallel" axis shard across v7x's
      two TensorCores.  The last grid step may be ragged (pl.cdiv grid); the
      batch is never padded up to a full tile multiple.
    """
    if B <= _SUBLANE:
        return B
    tb = min(block_b, B)
    half = _round_up(-(-B // 2), _SUBLANE)        # cdiv(B, 2), rounded to 8
    tb = min(tb, half)
    return max(_SUBLANE, (tb // _SUBLANE) * _SUBLANE)


# ---------------------------------------------------------------------------
# Pallas kernel: fused 2-layer MLP  y = relu(x @ W1 + b1) @ W2 + b2
# ---------------------------------------------------------------------------
def _mlp_kernel(x_ref, w1_ref, b1_ref, w2_ref, b2_ref, o_ref):
    x = x_ref[...].astype(w1_ref.dtype)                    # bf16 for the MXU
    h = jnp.dot(x, w1_ref[...], preferred_element_type=jnp.float32)
    h = jnp.maximum(h + b1_ref[...], 0.0)                  # f32 epilogue (v5e-safe)
    y = jnp.dot(h.astype(w2_ref.dtype), w2_ref[...],
                preferred_element_type=jnp.float32)
    o_ref[...] = (y + b2_ref[...]).astype(o_ref.dtype)


def mlp_forward(x, w1, b1, w2, b2, *, block_b=2048):
    """Fused MLP forward.  x: [B, f_in]; returns [B, f_out] in x.dtype."""
    B, f_in = x.shape
    f_in_w, hidden = w1.shape
    hidden_w, f_out = w2.shape
    assert f_in == f_in_w and hidden == hidden_w

    tb = _choose_batch_tile(B, block_b)
    grid = (pl.cdiv(B, tb),)

    return pl.pallas_call(
        _mlp_kernel,
        out_shape=jax.ShapeDtypeStruct((B, f_out), x.dtype),
        grid=grid,
        in_specs=[
            # Streamed activation tiles (double-buffered by default); last dim
            # equals the full array dim, so no feature padding is needed.
            pl.BlockSpec((tb, f_in), lambda i: (i, 0)),
            # Weights/biases: constant index_map -> VMEM-resident across steps.
            pl.BlockSpec((f_in, hidden), lambda i: (0, 0)),
            pl.BlockSpec((1, hidden), lambda i: (0, 0)),
            pl.BlockSpec((hidden, f_out), lambda i: (0, 0)),
            pl.BlockSpec((1, f_out), lambda i: (0, 0)),
        ],
        out_specs=pl.BlockSpec((tb, f_out), lambda i: (i, 0)),
        compiler_params=pltpu.CompilerParams(
            # "parallel" lets v7x shard batch tiles across its 2 TensorCores.
            dimension_semantics=("parallel",)),
    )(x, w1, b1, w2, b2)


# ---------------------------------------------------------------------------
# The wrapped net (deterministically-initialized 2-layer MLP)
# ---------------------------------------------------------------------------
class SimpleNet:
    def __init__(self, f_in=32, hidden=64, f_out=32, param_dtype=jnp.bfloat16):
        k = jax.random.PRNGKey(0)
        k1, k2, k3, k4 = jax.random.split(k, 4)
        s1 = 1.0 / jnp.sqrt(f_in)
        s2 = 1.0 / jnp.sqrt(hidden)
        # f32 master parameters (used by the reference check).
        self.w1 = jax.random.uniform(k1, (f_in, hidden), jnp.float32, -1.0, 1.0) * s1
        self.b1 = jax.random.uniform(k2, (1, hidden), jnp.float32, -1.0, 1.0) * s1
        self.w2 = jax.random.uniform(k3, (hidden, f_out), jnp.float32, -1.0, 1.0) * s2
        self.b2 = jax.random.uniform(k4, (1, f_out), jnp.float32, -1.0, 1.0) * s2
        # One-time kernel-parameter prep: bf16 weights, f32 biases (f32 epilogue).
        self.w1k = self.w1.astype(param_dtype)
        self.w2k = self.w2.astype(param_dtype)
        self.b1k = self.b1
        self.b2k = self.b2
        self._forward = jax.jit(mlp_forward)

    def __call__(self, x):
        return self._forward(x, self.w1k, self.b1k, self.w2k, self.b2k)

    def sample(self, *args, **kwargs):
        # TODO(synk): `net.sample` semantics are net-specific and undefined here.
        raise NotImplementedError


# ---------------------------------------------------------------------------
# DDP wrapper (JAX port of the PyTorch module, sans debug prints)
# ---------------------------------------------------------------------------
class DDP:
    def __init__(self, net):
        self.net = net

    def sample(self, *args, **kwargs):
        return self.net.sample(*args, **kwargs)

    def forward(self, *args):
        inputs = []
        for arg in args:
            if isinstance(arg, PackedTensor):
                inputs.append(arg.tensor)
            else:
                inputs.append(arg)
        return self.net(*inputs)

    __call__ = forward


def _reference(net, x):
    h = jnp.maximum(x @ net.w1 + net.b1, 0.0)
    return h @ net.w2 + net.b2


if __name__ == "__main__":
    F_IN, HIDDEN, F_OUT = 32, 64, 32
    net = SimpleNet(F_IN, HIDDEN, F_OUT)
    ddp = DDP(net)

    # Small demo batch (single grid step), wrapped in PackedTensor to exercise
    # the DDP unwrapping path.
    x_small = jax.random.normal(jax.random.PRNGKey(0), (8, F_IN), jnp.float32)
    out_small = jax.block_until_ready(ddp(PackedTensor(x_small)))
    assert out_small.shape == (8, F_OUT)
    # bf16 weights -> loosened tolerance vs. the f32 reference.
    assert jnp.allclose(out_small, _reference(net, x_small), atol=5e-2, rtol=5e-2)

    # Larger batch exercising the multi-step grid + ragged last tile
    # (200 rows -> tiles of 104 + 96; no batch padding, 2 grid steps).
    x_big = jax.random.normal(jax.random.PRNGKey(1), (200, F_IN), jnp.float32)
    out_big = jax.block_until_ready(ddp(PackedTensor(x_big)))
    assert out_big.shape == (200, F_OUT)
    assert jnp.allclose(out_big, _reference(net, x_big), atol=5e-2, rtol=5e-2)

    print("KERNEL_OK")
</pallas_src>

<mosaic_0001>
module attributes {stable_mosaic.version = 11 : i64} {
  func.func @_mlp_kernel(%arg0: i32, %arg1: memref<8x32xf32, #tpu.memory_space<vmem>>, %arg2: memref<32x64xbf16, #tpu.memory_space<vmem>>, %arg3: memref<1x64xf32, #tpu.memory_space<vmem>>, %arg4: memref<64x32xbf16, #tpu.memory_space<vmem>>, %arg5: memref<1x32xf32, #tpu.memory_space<vmem>>, %arg6: memref<8x32xf32, #tpu.memory_space<vmem>>) attributes {dimension_semantics = [#tpu.dimension_semantics<parallel>], iteration_bounds = array<i64: 1>, scalar_prefetch = 0 : i64, scratch_operands = 0 : i64, tpu.core_type = #tpu.core_type<tc>, window_params = [{transform_indices = @transform_0, window_bounds = array<i64: 8, 32>}, {pipeline_mode = #tpu.pipeline_mode<synchronous>, transform_indices = @transform_1, window_bounds = array<i64: 32, 64>}, {pipeline_mode = #tpu.pipeline_mode<synchronous>, transform_indices = @transform_2, window_bounds = array<i64: 1, 64>}, {pipeline_mode = #tpu.pipeline_mode<synchronous>, transform_indices = @transform_3, window_bounds = array<i64: 64, 32>}, {pipeline_mode = #tpu.pipeline_mode<synchronous>, transform_indices = @transform_4, window_bounds = array<i64: 1, 32>}, {transform_indices = @transform_5, window_bounds = array<i64: 8, 32>}]} {
    %c0 = arith.constant 0 : index
    %c0_0 = arith.constant 0 : index
    %0 = vector.load %arg1[%c0, %c0_0] : memref<8x32xf32, #tpu.memory_space<vmem>>, vector<8x32xf32>
    %1 = arith.truncf %0 : vector<8x32xf32> to vector<8x32xbf16>
    %c0_1 = arith.constant 0 : index
    %c0_2 = arith.constant 0 : index
    %2 = vector.load %arg2[%c0_1, %c0_2] : memref<32x64xbf16, #tpu.memory_space<vmem>>, vector<32x64xbf16>
    %cst = arith.constant dense<0.000000e+00> : vector<8x64xf32>
    %3 = tpu.matmul %1, %2, %cst {dimension_numbers = #tpu.dot_dimension_numbers<[1], [0], [0], [1], [0, 0, 1, 1], [], []>} : vector<8x32xbf16>, vector<32x64xbf16>, vector<8x64xf32> -> vector<8x64xf32>
    %c0_3 = arith.constant 0 : index
    %c0_4 = arith.constant 0 : index
    %4 = vector.load %arg3[%c0_3, %c0_4] : memref<1x64xf32, #tpu.memory_space<vmem>>, vector<1x64xf32>
    %5 = vector.broadcast %4 : vector<1x64xf32> to vector<8x64xf32>
    %6 = arith.addf %3, %5 : vector<8x64xf32>
    %cst_5 = arith.constant 0.000000e+00 : f32
    %7 = vector.broadcast %cst_5 : f32 to vector<8x64xf32>
    %8 = arith.maximumf %6, %7 : vector<8x64xf32>
    %9 = arith.truncf %8 : vector<8x64xf32> to vector<8x64xbf16>
    %c0_6 = arith.constant 0 : index
    %c0_7 = arith.constant 0 : index
    %10 = vector.load %arg4[%c0_6, %c0_7] : memref<64x32xbf16, #tpu.memory_space<vmem>>, vector<64x32xbf16>
    %cst_8 = arith.constant dense<0.000000e+00> : vector<8x32xf32>
    %11 = tpu.matmul %9, %10, %cst_8 {dimension_numbers = #tpu.dot_dimension_numbers<[1], [0], [0], [1], [0, 0, 1, 1], [], []>} : vector<8x64xbf16>, vector<64x32xbf16>, vector<8x32xf32> -> vector<8x32xf32>
    %c0_9 = arith.constant 0 : index
    %c0_10 = arith.constant 0 : index
    %12 = vector.load %arg5[%c0_9, %c0_10] : memref<1x32xf32, #tpu.memory_space<vmem>>, vector<1x32xf32>
    %13 = vector.broadcast %12 : vector<1x32xf32> to vector<8x32xf32>
    %14 = arith.addf %11, %13 : vector<8x32xf32>
    %c0_11 = arith.constant 0 : index
    %c0_12 = arith.constant 0 : index
    %15 = vector.load %arg6[%c0_11, %c0_12] : memref<8x32xf32, #tpu.memory_space<vmem>>, vector<8x32xf32>
    tpu.vector_store %arg6[%c0_11, %c0_12], %14 {strides = array<i32>} : memref<8x32xf32, #tpu.memory_space<vmem>>, vector<8x32xf32>,
    return
  }
  func.func @transform_0(%arg0: i32) -> (i32, i32) {
    %c0_i32 = arith.constant 0 : i32
    %c0_i32_0 = arith.constant 0 : i32
    return %arg0, %c0_i32 : i32, i32
  }
  func.func @transform_1(%arg0: i32) -> (i32, i32) {
    %c0_i32 = arith.constant 0 : i32
    %c0_i32_0 = arith.constant 0 : i32
    %c0_i32_1 = arith.constant 0 : i32
    return %c0_i32, %c0_i32_0 : i32, i32
  }
  func.func @transform_2(%arg0: i32) -> (i32, i32) {
    %c0_i32 = arith.constant 0 : i32
    %c0_i32_0 = arith.constant 0 : i32
    %c0_i32_1 = arith.constant 0 : i32
    return %c0_i32, %c0_i32_0 : i32, i32
  }
  func.func @transform_3(%arg0: i32) -> (i32, i32) {
    %c0_i32 = arith.constant 0 : i32
    %c0_i32_0 = arith.constant 0 : i32
    %c0_i32_1 = arith.constant 0 : i32
    return %c0_i32, %c0_i32_0 : i32, i32
  }
  func.func @transform_4(%arg0: i32) -> (i32, i32) {
    %c0_i32 = arith.constant 0 : i32
    %c0_i32_0 = arith.constant 0 : i32
    %c0_i32_1 = arith.constant 0 : i32
    return %c0_i32, %c0_i32_0 : i32, i32
  }
  func.func @transform_5(%arg0: i32) -> (i32, i32) {
    %c0_i32 = arith.constant 0 : i32
    %c0_i32_0 = arith.constant 0 : i32
    return %arg0, %c0_i32 : i32, i32
  }
}

</mosaic_0001>

<bundles_post_ra>
// kernel: mlp_forward.1
= control target key start
LH: loop header
LB: loop body
LE: loop exit
PB: predicated region body
PF: predicated region fallthrough
CT: control target
= control target key end

     0   :  { %v260_v1 = vmov 0.0   ;;  %vm261_vm0 = vmmov 0   ;;  %vm47_vm1 = vcmask 261120   ;;  %s325_s0 = inlined_call_operand.vmem [shape: f32[8,32], index: 0, kind: input, shape index: {}]   ;;  %s326_s1 = inlined_call_operand.vmem [shape: bf16[32,64], index: 1, kind: input, shape index: {}]   ;;  %s327_s2 = inlined_call_operand.vmem [shape: f32[1,64], index: 2, kind: input, shape index: {}]   ;;  %s328_s3 = inlined_call_operand.vmem [shape: bf16[64,32], index: 3, kind: input, shape index: {}]   ;;  %s329_s4 = inlined_call_operand.vmem [shape: f32[1,32], index: 4, kind: input, shape index: {}]   ;;  %s330_s5 = inlined_call_operand.hbm [shape: f32[8,32], index: 5, kind: output, shape index: {}]  }
   0x1   :  { %v232_v0 = vld [vmem:[%s326_s1 + $0x8] sm:$0xff]   ;;  %209 = vmatprep.subr.bf16.mxu0 %v260_v1  ;;  %v233_v2 = vld [vmem:[%s326_s1] sm:$0xff]   ;;  %217 = vmatprep.subr.bf16.mxu1 %v260_v1  ;;  %v234_v4 = vld [vmem:[%s328_s3 + $0x18] sm:$0xff]  }
   0x2   :  { %210 = vmatpush3.bf16.msra.mxu0 %v232_v0  ;;  %213 = vmatprep.mubr.msk.bf16.mxu0 %vm261_vm0, %v260_v1  ;;  %v22_v3 = vld [vmem:[%s325_s0] sm:$0xff]  ;;  %v235_v5 = vld [vmem:[%s328_s3 + $0x10] sm:$0xff]  }
   0x3   :  { %211 = vmatprep.subr.bf16.mxu0 %v260_v1  ;;  %225 = vmatprep.mubr.msk.bf16.mxu1 %vm261_vm0, %v260_v1  ;;  %v23_v6 = vpack.c.bf16 %v22_v3, %v22_v3 }
   0x4   :  { %218 = vmatpush3.bf16.msra.mxu1 %v234_v4 }
   0x5   :  { %219 = vmatprep.subr.bf16.mxu1 %v260_v1 }
   0x6   :  { %212 = vmatpush3.bf16.msra.mxu0 %v233_v2 }
   0x7   :  { %10 = vsyncpa [#allocation3], 0  ;;  %v236_v7 = vld [vmem:[%s328_s3 + $0x8] sm:$0xff]   ;;  %v237_v8 = vld [vmem:[%s328_s3] sm:$0xff]   ;;  %vm132_vm2 = vcmask 523264   ;;  %s262_s9 = smov [#allocation2]  }
   0x8   :  { %220 = vmatpush3.bf16.msra.mxu1 %v235_v5  ;;  %v191_v9 = vld [vmem:[%s327_s2] ss:$0 sm:$0xff]  ;;  %s183_s3 = sshll.u32 %s262_s9, 4  ;;  %s184_s3 = int_to_ptr.vmem [resolvable:$true] %s183_s3 }
   0x9   :  { %214 = vmatmul.mubr.msk.bf16.vlgmr.msra.gmra.mxu0 %vm47_vm1, %v23_v6  ;;  %221 = vmatprep.subr.bf16.mxu1 %v260_v1  ;;  %v195_v17 = vld [vmem:[%s329_s4] ss:$0 sm:$0xff]  ;;  %s238_s2 = scalar_lea.vmem %s184_s3, 128  ;;  %p243_p1 = scmp.lt.s32.totalorder %s184_s3, %s184_s3 }
   0xa   :  { %p239_p0 = scmp.ne.s32.totalorder %s184_s3, %s238_s2  ;;  %p244_p2 = scmp.lt.s32.totalorder %s238_s2, %s238_s2 }
   0xc   :  { %222 = vmatpush3.bf16.msra.mxu1 %v236_v7  ;;  %p245_p3 = por %p244_p2, %p243_p1 }
   0xd   :  { %223 = vmatprep.subr.bf16.mxu1 %v260_v1 }
   0xe   :  { %p246_p4 = pnand %p245_p3, %p239_p0 }
  0x10   :  { %224 = vmatpush3.bf16.msra.mxu1 %v237_v8 }
  0xc9   :  { %v85_v10 = vpop.f32.mrf.mxu0 }
  0xca   :  { %v86_v11 = vadd.f32 %v191_v9, %v85_v10 }
  0xcb   :  { %v215_v12 = vpop.f32.mrf.mxu0 }
  0xcc   :  { %v91_v13 = vmax.f32 %v86_v11, 0.0 }
  0xcd   :  { %v88_v14 = vpop.f32.mrf.mxu0 }
  0xce   :  { %v92_v15 = vpack.c.bf16 %v91_v13, %v91_v13 }
  0xcf   :  { %v216_v16 = vpop.f32.mrf.mxu0 }
  0xd0   :  { %226 = vmatmul.mubr.msk.bf16.vlgmr.msra.gmra.mxu1 %vm132_vm2, %v92_v15 }
 0x190   :  { %v170_v18 = vpop.f32.mrf.mxu1 }
 0x191   :  { %v171_v19 = vadd.f32 %v195_v17, %v170_v18 }
 0x192   :  { %v227_v20 = vpop.f32.mrf.mxu1 }
 0x193   :  { %176 = vst.msk [vmem:[#allocation2] sm:$0xff] %vm47_vm1, %v171_v19 }
 0x194   :  { %v173_v21 = vpop.f32.mrf.mxu1 }
 0x195   :  { %249 = shalt.err (!%p246_p4)
}
 0x196   :  { %186 = dma.vmem_to_hbm [thread:$0]  %s184_s3, 128, %s330_s5, [#allocation3]   ;;  %v228_v22 = vpop.f32.mrf.mxu1 }
 0x197   :  { %258 = dma.done.wait [#allocation3], 128  }
 0x198   :  { %259 = vsyncadd [#allocation3], 4294967168 }
 0x199   :  { %190 = vsyncpa [#allocation3], 1 }

</bundles_post_ra>
